<compile_context>
chip_gen: v7x
topology: tpu7x:2x2x1
jax: 0.10.0
libtpu: 0.0.40
codegen_flags: <defaults>
</compile_context>

<pallas_src>
import functools

import jax
import jax.numpy as jnp
from jax.experimental import pallas as pl
from jax.experimental.pallas import tpu as pltpu

D_IN, D_H1, D_H2, D_OUT = 768, 128, 64, 5
BN_EPS = 1e-5


def _round_up(x, m):
    return (x + m - 1) // m * m


def _mlp_kernel(x_ref, eb_ref, w1_ref, b1_ref, w2_ref, b2_ref, wx_ref, o_ref):
    # layer_1 (bf16 inputs, f32 accumulation) + ReLU.  BN1 is folded into w2/b2.
    h1 = jnp.dot(x_ref[...], w1_ref[...],
                 preferred_element_type=jnp.float32) + b1_ref[...]
    h1 = jnp.maximum(h1, 0.0)
    # layer_2 (BN1-folded weights) + ReLU.  BN2 is folded into wx / extra bias.
    h2 = jnp.dot(h1, w2_ref[...],
                 preferred_element_type=jnp.float32) + b2_ref[...]
    h2 = jnp.maximum(h2, 0.0)
    # layer_out: cat((h2, rating, hedge)) @ W_out + b_out is equivalent to
    # h2 @ wx + (rating*wr + hedge*wh + bn2_shift@wx + b_out), where the
    # parenthesized term was precomputed in the wrapper as eb (extra bias).
    logits = jnp.dot(h2, wx_ref[...],
                     preferred_element_type=jnp.float32) + eb_ref[...]
    # Dropout is identity at inference time.
    # softmax(dim=1); divide goes to the EUP via approximate reciprocal.
    m = jnp.max(logits, axis=1, keepdims=True)
    e = jnp.exp(logits - m)
    o_ref[...] = e * pl.reciprocal(jnp.sum(e, axis=1, keepdims=True), approx=True)


@functools.partial(jax.jit, static_argnames=("tb", "matmul_dtype"))
def binary_classification_forward(inputs, rating, hedge_score, params, *,
                                  tb=1024, matmul_dtype=jnp.bfloat16):
    """inputs: (B, 1, 768), rating: (B,), hedge_score: (B,) -> (B, 5) f32 probs."""
    x = jnp.squeeze(inputs, axis=1).astype(jnp.float32)        # (B, 768)
    B = x.shape[0]

    # ---- Fold BatchNorm1d (eval mode) into the *downstream* linear layers. ----
    def bn_fold(gamma, beta, mean, var):
        scale = gamma / jnp.sqrt(var + BN_EPS)
        shift = beta - mean * scale
        return scale, shift

    s1, t1 = bn_fold(params["bn1_gamma"], params["bn1_beta"],
                     params["bn1_mean"], params["bn1_var"])
    s2, t2 = bn_fold(params["bn2_gamma"], params["bn2_beta"],
                     params["bn2_mean"], params["bn2_var"])

    w1 = params["w1"].T                                        # (768, 128)
    b1 = params["b1"][None, :]                                 # (1, 128)
    # BN1: (h1*s1 + t1) @ W2^T + b2 == h1 @ (s1[:,None]*W2^T) + (t1 @ W2^T + b2)
    w2 = s1[:, None] * params["w2"].T                          # (128, 64)
    b2 = (t1 @ params["w2"].T + params["b2"])[None, :]         # (1, 64)

    w_out = params["w_out"].T                                  # (66, 5)
    wx_raw = w_out[:D_H2, :]                                   # (64, 5)
    wr = w_out[D_H2:D_H2 + 1, :]                               # (1, 5)
    wh = w_out[D_H2 + 1:D_H2 + 2, :]                           # (1, 5)
    # BN2: (h2*s2 + t2) @ wx + bias == h2 @ (s2[:,None]*wx) + (t2 @ wx + bias)
    wx = s2[:, None] * wx_raw                                  # (64, 5)
    bo = (t2 @ wx_raw + params["b_out"])[None, :]              # (1, 5)

    # Rating / hedge contribution + all output-side biases, precomputed once.
    extra_bias = (rating.astype(jnp.float32)[:, None] * wr
                  + hedge_score.astype(jnp.float32)[:, None] * wh
                  + bo)                                        # (B, 5)

    # ---- Tile sizing: large tiles, >=2 grid steps when possible, pad tail. ----
    # VMEM budget (v7x 64 MiB physical / 32 MiB scoped): at tb=1024 the
    # double-buffered bf16 x tile is ~3 MiB + <1 MiB weights/eb/out -> safe.
    tb_eff = max(8, min(tb, _round_up(pl.cdiv(B, 2), 8)))
    B_pad = _round_up(B, tb_eff)
    if B_pad != B:
        x = jnp.pad(x, ((0, B_pad - B), (0, 0)))
        extra_bias = jnp.pad(extra_bias, ((0, B_pad - B), (0, 0)))

    # Ship the big operands as bf16 (halves HBM traffic); accumulate in f32.
    x = x.astype(matmul_dtype)
    w1 = w1.astype(matmul_dtype)

    full = lambda shape: pl.BlockSpec(shape, lambda i: (0, 0))

    grid_spec = pltpu.PrefetchScalarGridSpec(
        num_scalar_prefetch=0,
        grid=(B_pad // tb_eff,),
        in_specs=[
            pl.BlockSpec((tb_eff, D_IN), lambda i: (i, 0)),    # x tile (bf16)
            pl.BlockSpec((tb_eff, D_OUT), lambda i: (i, 0)),   # extra-bias tile
            full((D_IN, D_H1)),                                # w1 (bf16)
            full((1, D_H1)),                                   # b1
            full((D_H1, D_H2)),                                # w2 (BN1 folded)
            full((1, D_H2)),                                   # b2 (BN1 folded)
            full((D_H2, D_OUT)),                               # wx (BN2 folded)
        ],
        out_specs=pl.BlockSpec((tb_eff, D_OUT), lambda i: (i, 0)),
    )

    out = pl.pallas_call(
        _mlp_kernel,
        out_shape=jax.ShapeDtypeStruct((B_pad, D_OUT), jnp.float32),
        grid_spec=grid_spec,
        compiler_params=pltpu.CompilerParams(
            dimension_semantics=("parallel",)),
    )(x, extra_bias, w1, b1, w2, b2, wx)

    return out[:B]


def init_params(key):
    ks = jax.random.split(key, 12)

    def linear_init(kw, kb, fan_out, fan_in):
        bound = 1.0 / jnp.sqrt(fan_in)
        w = jax.random.uniform(kw, (fan_out, fan_in), jnp.float32, -bound, bound)
        b = jax.random.uniform(kb, (fan_out,), jnp.float32, -bound, bound)
        return w, b

    w1, b1 = linear_init(ks[0], ks[1], D_H1, D_IN)
    w2, b2 = linear_init(ks[2], ks[3], D_H2, D_H1)
    w_out, b_out = linear_init(ks[4], ks[5], D_OUT, D_H2 + 2)

    return dict(
        w1=w1, b1=b1, w2=w2, b2=b2, w_out=w_out, b_out=b_out,
        bn1_gamma=1.0 + 0.1 * jax.random.normal(ks[6], (D_H1,), jnp.float32),
        bn1_beta=0.1 * jax.random.normal(ks[7], (D_H1,), jnp.float32),
        bn1_mean=0.05 * jax.random.normal(ks[8], (D_H1,), jnp.float32),
        bn1_var=jnp.ones((D_H1,), jnp.float32),
        bn2_gamma=1.0 + 0.1 * jax.random.normal(ks[9], (D_H2,), jnp.float32),
        bn2_beta=0.1 * jax.random.normal(ks[10], (D_H2,), jnp.float32),
        bn2_mean=0.05 * jax.random.normal(ks[11], (D_H2,), jnp.float32),
        bn2_var=jnp.ones((D_H2,), jnp.float32),
    )


def reference_forward(inputs, rating, hedge_score, p, *, matmul_dtype=None):
    """Pure-JAX reference of the PyTorch forward (eval mode). If matmul_dtype
    is given, the first matmul's operands are cast through it to emulate the
    kernel's bf16 input path (accumulation stays f32)."""
    x = jnp.squeeze(inputs, axis=1)
    r = rating[:, None]
    h = hedge_score[:, None]

    def bn(x, g, b, m, v):
        return (x - m) / jnp.sqrt(v + BN_EPS) * g + b

    w1 = p["w1"]
    if matmul_dtype is not None:
        x = x.astype(matmul_dtype).astype(jnp.float32)
        w1 = w1.astype(matmul_dtype).astype(jnp.float32)

    x = jax.nn.relu(x @ w1.T + p["b1"])
    x = bn(x, p["bn1_gamma"], p["bn1_beta"], p["bn1_mean"], p["bn1_var"])
    x = jax.nn.relu(x @ p["w2"].T + p["b2"])
    x = bn(x, p["bn2_gamma"], p["bn2_beta"], p["bn2_mean"], p["bn2_var"])
    x = jnp.concatenate([x, r, h], axis=1)
    x = x @ p["w_out"].T + p["b_out"]
    return jax.nn.softmax(x, axis=1)


if __name__ == "__main__":
    key = jax.random.PRNGKey(0)
    kp, kx, kr, kh = jax.random.split(key, 4)
    params = init_params(kp)

    # Small, deterministic example (B=12 also exercises the pad-to-tile path).
    B = 12
    inputs = jax.random.normal(kx, (B, 1, D_IN), jnp.float32)
    rating = jax.random.uniform(kr, (B,), jnp.float32, 0.0, 5.0)
    hedge_score = jax.random.uniform(kh, (B,), jnp.float32, 0.0, 1.0)

    out = binary_classification_forward(inputs, rating, hedge_score, params)
    out = jax.block_until_ready(out)
    assert out.shape == (B, D_OUT)

    # Tight check vs. a reference that matches the kernel's bf16 input path.
    ref_matched = reference_forward(inputs, rating, hedge_score, params,
                                    matmul_dtype=jnp.bfloat16)
    assert jnp.allclose(out, ref_matched, atol=5e-3, rtol=5e-3)

    # Looser check vs. the exact f32 PyTorch-equivalent reference.
    ref_f32 = reference_forward(inputs, rating, hedge_score, params)
    assert jnp.allclose(out, ref_f32, atol=3e-2, rtol=3e-2)

    print("KERNEL_OK")
</pallas_src>

<mosaic_0001>
module attributes {stable_mosaic.version = 11 : i64} {
  func.func @_mlp_kernel(%arg0: i32, %arg1: memref<8x768xbf16, #tpu.memory_space<vmem>>, %arg2: memref<8x5xf32, #tpu.memory_space<vmem>>, %arg3: memref<768x128xbf16, #tpu.memory_space<vmem>>, %arg4: memref<1x128xf32, #tpu.memory_space<vmem>>, %arg5: memref<128x64xf32, #tpu.memory_space<vmem>>, %arg6: memref<1x64xf32, #tpu.memory_space<vmem>>, %arg7: memref<64x5xf32, #tpu.memory_space<vmem>>, %arg8: memref<8x5xf32, #tpu.memory_space<vmem>>) attributes {dimension_semantics = [#tpu.dimension_semantics<parallel>], iteration_bounds = array<i64: 2>, scalar_prefetch = 0 : i64, scratch_operands = 0 : i64, tpu.core_type = #tpu.core_type<tc>, window_params = [{transform_indices = @transform_0, window_bounds = array<i64: 8, 768>}, {transform_indices = @transform_1, window_bounds = array<i64: 8, 5>}, {pipeline_mode = #tpu.pipeline_mode<synchronous>, transform_indices = @transform_2, window_bounds = array<i64: 768, 128>}, {pipeline_mode = #tpu.pipeline_mode<synchronous>, transform_indices = @transform_3, window_bounds = array<i64: 1, 128>}, {pipeline_mode = #tpu.pipeline_mode<synchronous>, transform_indices = @transform_4, window_bounds = array<i64: 128, 64>}, {pipeline_mode = #tpu.pipeline_mode<synchronous>, transform_indices = @transform_5, window_bounds = array<i64: 1, 64>}, {pipeline_mode = #tpu.pipeline_mode<synchronous>, transform_indices = @transform_6, window_bounds = array<i64: 64, 5>}, {transform_indices = @transform_7, window_bounds = array<i64: 8, 5>}]} {
    %c0 = arith.constant 0 : index
    %c0_0 = arith.constant 0 : index
    %0 = vector.load %arg1[%c0, %c0_0] : memref<8x768xbf16, #tpu.memory_space<vmem>>, vector<8x768xbf16>
    %c0_1 = arith.constant 0 : index
    %c0_2 = arith.constant 0 : index
    %1 = vector.load %arg3[%c0_1, %c0_2] : memref<768x128xbf16, #tpu.memory_space<vmem>>, vector<768x128xbf16>
    %cst = arith.constant dense<0.000000e+00> : vector<8x128xf32>
    %2 = tpu.matmul %0, %1, %cst {dimension_numbers = #tpu.dot_dimension_numbers<[1], [0], [0], [1], [0, 0, 1, 1], [], []>} : vector<8x768xbf16>, vector<768x128xbf16>, vector<8x128xf32> -> vector<8x128xf32>
    %c0_3 = arith.constant 0 : index
    %c0_4 = arith.constant 0 : index
    %3 = vector.load %arg4[%c0_3, %c0_4] : memref<1x128xf32, #tpu.memory_space<vmem>>, vector<1x128xf32>
    %4 = vector.broadcast %3 : vector<1x128xf32> to vector<8x128xf32>
    %5 = arith.addf %2, %4 : vector<8x128xf32>
    %cst_5 = arith.constant 0.000000e+00 : f32
    %6 = vector.broadcast %cst_5 : f32 to vector<8x128xf32>
    %7 = arith.maximumf %5, %6 : vector<8x128xf32>
    %c0_6 = arith.constant 0 : index
    %c0_7 = arith.constant 0 : index
    %8 = vector.load %arg5[%c0_6, %c0_7] : memref<128x64xf32, #tpu.memory_space<vmem>>, vector<128x64xf32>
    %cst_8 = arith.constant dense<0.000000e+00> : vector<8x64xf32>
    %9 = tpu.matmul %7, %8, %cst_8 {dimension_numbers = #tpu.dot_dimension_numbers<[1], [0], [0], [1], [0, 0, 1, 1], [], []>} : vector<8x128xf32>, vector<128x64xf32>, vector<8x64xf32> -> vector<8x64xf32>
    %c0_9 = arith.constant 0 : index
    %c0_10 = arith.constant 0 : index
    %10 = vector.load %arg6[%c0_9, %c0_10] : memref<1x64xf32, #tpu.memory_space<vmem>>, vector<1x64xf32>
    %11 = vector.broadcast %10 : vector<1x64xf32> to vector<8x64xf32>
    %12 = arith.addf %9, %11 : vector<8x64xf32>
    %cst_11 = arith.constant 0.000000e+00 : f32
    %13 = vector.broadcast %cst_11 : f32 to vector<8x64xf32>
    %14 = arith.maximumf %12, %13 : vector<8x64xf32>
    %c0_12 = arith.constant 0 : index
    %c0_13 = arith.constant 0 : index
    %15 = vector.load %arg7[%c0_12, %c0_13] : memref<64x5xf32, #tpu.memory_space<vmem>>, vector<64x5xf32>
    %cst_14 = arith.constant dense<0.000000e+00> : vector<8x5xf32>
    %16 = tpu.matmul %14, %15, %cst_14 {dimension_numbers = #tpu.dot_dimension_numbers<[1], [0], [0], [1], [0, 0, 1, 1], [], []>} : vector<8x64xf32>, vector<64x5xf32>, vector<8x5xf32> -> vector<8x5xf32>
    %c0_15 = arith.constant 0 : index
    %c0_16 = arith.constant 0 : index
    %17 = vector.load %arg2[%c0_15, %c0_16] : memref<8x5xf32, #tpu.memory_space<vmem>>, vector<8x5xf32>
    %18 = arith.addf %16, %17 : vector<8x5xf32>
    %cst_17 = arith.constant dense<0xFF800000> : vector<8xf32>
    %19 = vector.multi_reduction <maximumf>, %18, %cst_17 [1] : vector<8x5xf32> to vector<8xf32>
    %20 = vector.shape_cast %19 : vector<8xf32> to vector<8x1xf32>
    %21 = vector.broadcast %20 : vector<8x1xf32> to vector<8x5xf32>
    %22 = arith.subf %18, %21 : vector<8x5xf32>
    %23 = math.exp %22 : vector<8x5xf32>
    %cst_18 = arith.constant dense<0.000000e+00> : vector<8xf32>
    %24 = vector.multi_reduction <add>, %23, %cst_18 [1] : vector<8x5xf32> to vector<8xf32>
    %25 = vector.shape_cast %24 : vector<8xf32> to vector<8x1xf32>
    %26 = tpu.reciprocal %25 {approx = true} : vector<8x1xf32> -> vector<8x1xf32>
    %27 = vector.broadcast %26 : vector<8x1xf32> to vector<8x5xf32>
    %28 = arith.mulf %23, %27 : vector<8x5xf32>
    %c0_19 = arith.constant 0 : index
    %c0_20 = arith.constant 0 : index
    %29 = vector.load %arg8[%c0_19, %c0_20] : memref<8x5xf32, #tpu.memory_space<vmem>>, vector<8x5xf32>
    tpu.vector_store %arg8[%c0_19, %c0_20], %28 {strides = array<i32>} : memref<8x5xf32, #tpu.memory_space<vmem>>, vector<8x5xf32>,
    return
  }
  func.func @transform_0(%arg0: i32) -> (i32, i32) {
    %c0_i32 = arith.constant 0 : i32
    %c0_i32_0 = arith.constant 0 : i32
    return %arg0, %c0_i32 : i32, i32
  }
  func.func @transform_1(%arg0: i32) -> (i32, i32) {
    %c0_i32 = arith.constant 0 : i32
    %c0_i32_0 = arith.constant 0 : i32
    return %arg0, %c0_i32 : i32, i32
  }
  func.func @transform_2(%arg0: i32) -> (i32, i32) {
    %c0_i32 = arith.constant 0 : i32
    %c0_i32_0 = arith.constant 0 : i32
    %c0_i32_1 = arith.constant 0 : i32
    return %c0_i32, %c0_i32_0 : i32, i32
  }
  func.func @transform_3(%arg0: i32) -> (i32, i32) {
    %c0_i32 = arith.constant 0 : i32
    %c0_i32_0 = arith.constant 0 : i32
    %c0_i32_1 = arith.constant 0 : i32
    return %c0_i32, %c0_i32_0 : i32, i32
  }
  func.func @transform_4(%arg0: i32) -> (i32, i32) {
    %c0_i32 = arith.constant 0 : i32
    %c0_i32_0 = arith.constant 0 : i32
    %c0_i32_1 = arith.constant 0 : i32
    return %c0_i32, %c0_i32_0 : i32, i32
  }
  func.func @transform_5(%arg0: i32) -> (i32, i32) {
    %c0_i32 = arith.constant 0 : i32
    %c0_i32_0 = arith.constant 0 : i32
    %c0_i32_1 = arith.constant 0 : i32
    return %c0_i32, %c0_i32_0 : i32, i32
  }
  func.func @transform_6(%arg0: i32) -> (i32, i32) {
    %c0_i32 = arith.constant 0 : i32
    %c0_i32_0 = arith.constant 0 : i32
    %c0_i32_1 = arith.constant 0 : i32
    return %c0_i32, %c0_i32_0 : i32, i32
  }
  func.func @transform_7(%arg0: i32) -> (i32, i32) {
    %c0_i32 = arith.constant 0 : i32
    %c0_i32_0 = arith.constant 0 : i32
    return %arg0, %c0_i32 : i32, i32
  }
}

</mosaic_0001>

<bundles_post_ra>
// kernel: binary_classification_forward.1
= control target key start
LH: loop header
LB: loop body
LE: loop exit
PB: predicated region body
PF: predicated region fallthrough
CT: control target
= control target key end

     0   :  { %s1456_s24 = smov 0   ;;  %s1714_s0 = inlined_call_operand.vmem [shape: bf16[16,768], index: 0, kind: input, shape index: {}]   ;;  %s1715_s1 = inlined_call_operand.vmem [shape: f32[16,5], index: 1, kind: input, shape index: {}]   ;;  %s1716_s2 = inlined_call_operand.vmem [shape: bf16[768,128], index: 2, kind: input, shape index: {}]   ;;  %s1717_s3 = inlined_call_operand.vmem [shape: f32[1,128], index: 3, kind: input, shape index: {}]   ;;  %s1718_s4 = inlined_call_operand.vmem [shape: f32[128,64], index: 4, kind: input, shape index: {}]   ;;  %s1719_s5 = inlined_call_operand.vmem [shape: f32[1,64], index: 5, kind: input, shape index: {}]   ;;  %s1720_s6 = inlined_call_operand.vmem [shape: f32[64,5], index: 6, kind: input, shape index: {}]   ;;  %s1721_s7 = inlined_call_operand.vmem [shape: f32[16,5], index: 7, kind: output, shape index: {}]  }
   0x1 LB: > { %s1086_s25 = sadd.s32 4294967295, %s1411_s24   ;;  %p1090_p0 = scmp.ge.s32.totalorder %s1411_s24, 1  ;;  %s1411_s24 = sphi %s1456_s24, %s17_s24  }
   0x2   : > { %p246_p1 = scmp.lt.s32.totalorder %s1411_s24, 3 }
   0x4   : > { %p247_p2 = pnand %p1090_p0, %p246_p1 }
   0x5   : > { %v1347_v0 = vld [vmem:[%s1716_s2 + $0x40] sm:$0xff] (!%p247_p2)   ;;  %v1351_v4 = vld [vmem:[%s1716_s2 + $0x48] sm:$0xff] (!%p247_p2)   ;;  %v1355_v8 = vld [vmem:[%s1716_s2 + $0x50] sm:$0xff] (!%p247_p2)   ;;  %p281_p3 = scmp.lt.s32.totalorder (!%p247_p2), %s1086_s25, 1  ;;  %v1413_v60 = vmov (!%p247_p2), 0.0|0.0   ;;  %vm1414_vm0 = vmmov (!%p247_p2), 0  }
   0x6   : > { %250 = sbr.rel (%p247_p2) target bundleno = 1034 (0x40a), region = 48  ;;  %v1348_v1 = vld [vmem:[%s1716_s2] sm:$0xff] (!%p247_p2)   ;;  %1153 = vmatprep.subr.bf16.mxu0 (!%p247_p2), %v1347_v0  ;;  %v1352_v5 = vld [vmem:[%s1716_s2 + $0x8] sm:$0xff] (!%p247_p2)   ;;  %v1356_v9 = vld [vmem:[%s1716_s2 + $0x10] sm:$0xff] (!%p247_p2)   ;;  %vm934_vm1 = vcmask (!%p247_p2), 523264   ;;  %vm1008_vm2 = vcmask (!%p247_p2), 39936  }
   0x7   : > { %v1349_v2 = vld [vmem:[%s1716_s2 + $0xc0] sm:$0xff] (!%p247_p2)   ;;  %1154 = vmatpush3.bf16.msra.mxu0 (!%p247_p2), %v1348_v1  ;;  %v1353_v6 = vld [vmem:[%s1716_s2 + $0xc8] sm:$0xff] (!%p247_p2)   ;;  %v1357_v10 = vld [vmem:[%s1716_s2 + $0xd0] sm:$0xff] (!%p247_p2)  }
   0x8   : > { %v1350_v3 = vld [vmem:[%s1716_s2 + $0x80] sm:$0xff] (!%p247_p2)   ;;  %1175 = vmatprep.subr.bf16.mxu1 (!%p247_p2), %v1349_v2  ;;  %1155 = vmatprep.subr.bf16.mxu0 (!%p247_p2), %v1351_v4  ;;  %v1354_v7 = vld [vmem:[%s1716_s2 + $0x88] sm:$0xff] (!%p247_p2)   ;;  %v1358_v11 = vld [vmem:[%s1716_s2 + $0x90] sm:$0xff] (!%p247_p2)  }
   0x9   : > { %1176 = vmatpush3.bf16.msra.mxu1 (!%p247_p2), %v1350_v3  ;;  %v1359_v12 = vld [vmem:[%s1716_s2 + $0x58] sm:$0xff] (!%p247_p2)   ;;  %v1363_v16 = vld [vmem:[%s1716_s2 + $0x60] sm:$0xff] (!%p247_p2)   ;;  %v1367_v20 = vld [vmem:[%s1716_s2 + $0x68] sm:$0xff] (!%p247_p2)  }
   0xa   : > { %1177 = vmatprep.subr.bf16.mxu1 (!%p247_p2), %v1353_v6  ;;  %v1360_v13 = vld [vmem:[%s1716_s2 + $0x18] sm:$0xff] (!%p247_p2)   ;;  %v1364_v17 = vld [vmem:[%s1716_s2 + $0x20] sm:$0xff] (!%p247_p2)   ;;  %v1368_v21 = vld [vmem:[%s1716_s2 + $0x28] sm:$0xff] (!%p247_p2)  }
   0xb   : > { %1156 = vmatpush3.bf16.msra.mxu0 (!%p247_p2), %v1352_v5  ;;  %v1361_v14 = vld [vmem:[%s1716_s2 + $0xd8] sm:$0xff] (!%p247_p2)   ;;  %v1365_v18 = vld [vmem:[%s1716_s2 + $0xe0] sm:$0xff] (!%p247_p2)   ;;  %v1369_v22 = vld [vmem:[%s1716_s2 + $0xe8] sm:$0xff] (!%p247_p2)  }
   0xc   : > { %1157 = vmatprep.subr.bf16.mxu0 (!%p247_p2), %v1355_v8  ;;  %v1362_v15 = vld [vmem:[%s1716_s2 + $0x98] sm:$0xff] (!%p247_p2)   ;;  %v1366_v19 = vld [vmem:[%s1716_s2 + $0xa0] sm:$0xff] (!%p247_p2)   ;;  %v1370_v23 = vld [vmem:[%s1716_s2 + $0xa8] sm:$0xff] (!%p247_p2)  }
   0xd   : > { %1178 = vmatpush3.bf16.msra.mxu1 %v1354_v7  ;;  %s1723_s25 = smov (!%p281_p3, %s1086_s25), 1  ;;  %v1371_v24 = vld [vmem:[%s1716_s2 + $0x70] sm:$0xff]   ;;  %v1375_v28 = vld [vmem:[%s1716_s2 + $0x78] sm:$0xff]   ;;  %v1381_v35 = vld [vmem:[%s1716_s2 + $0x140] sm:$0xff]  }
   0xe   : > { %1179 = vmatprep.subr.bf16.mxu1 %v1357_v10  ;;  %s1335_s11 = smul.u32 24, %s1723_s25  ;;  %v1372_v25 = vld [vmem:[%s1716_s2 + $0x30] sm:$0xff]   ;;  %v1376_v29 = vld [vmem:[%s1716_s2 + $0x38] sm:$0xff]   ;;  %v1384_v39 = vld [vmem:[%s1716_s2 + $0x100] sm:$0xff]   ;;  %s1092_s9 = sshll.u32 %s1723_s25, 3 }
   0xf   : > { %1158 = vmatpush3.bf16.msra.mxu0 %v1356_v9  ;;  %v1373_v26 = vld [vmem:[%s1716_s2 + $0xf0] sm:$0xff]   ;;  %v1377_v30 = vld [vmem:[%s1716_s2 + $0xf8] sm:$0xff]   ;;  %v1385_v40 = vld [vmem:[%s1716_s2 + $0x148] sm:$0xff]   ;;  %s289_s12 = scalar_lea.vmem %s1715_s1, %s1092_s9  ;;  %s293_s14 = scalar_lea.vmem %s1721_s7, %s1092_s9 }
  0x10   : > { %1159 = vmatprep.subr.bf16.mxu0 %v1359_v12  ;;  %v1374_v27 = vld [vmem:[%s1716_s2 + $0xb0] sm:$0xff]   ;;  %s1561_s22 = scalar_lea.vmem %s1714_s0, %s1335_s11  ;;  %v1380_v34 = vld [vmem:[%s1716_s2 + $0xb8] sm:$0xff]   ;;  %v1386_v41 = vld [vmem:[%s1716_s2 + $0x108] sm:$0xff]  }
  0x11   : > { %1180 = vmatpush3.bf16.msra.mxu1 %v1358_v11  ;;  %v295_v31 = vld [vmem:[%s1561_s22] sm:$0xff]  ;;  %v296_v36 = vld [vmem:[%s1561_s22 + $0x8] sm:$0xff]  ;;  %v1387_v42 = vld [vmem:[%s1716_s2 + $0x150] sm:$0xff]  }
  0x12   : > { %1181 = vmatprep.subr.bf16.mxu1 %v1361_v14  ;;  %v1095_v32 = vcombine.low %v295_v31, %v295_v31  ;;  %v1096_v33 = vcombine.high %v295_v31, %v295_v31  ;;  %v1097_v37 = vcombine.low %v296_v36, %v296_v36  ;;  %v1098_v38 = vcombine.high %v296_v36, %v296_v36  ;;  %v1388_v43 = vld [vmem:[%s1716_s2 + $0x110] sm:$0xff]   ;;  %v1389_v44 = vld [vmem:[%s1716_s2 + $0x158] sm:$0xff]   ;;  %v1391_v46 = vld [vmem:[%s1716_s2 + $0x160] sm:$0xff]  }
  0x13   : > { %1160 = vmatpush3.bf16.msra.mxu0 %v1360_v13  ;;  %v1390_v45 = vld [vmem:[%s1716_s2 + $0x118] sm:$0xff]   ;;  %v1392_v47 = vld [vmem:[%s1716_s2 + $0x120] sm:$0xff]   ;;  %v297_v48 = vld [vmem:[%s1561_s22 + $0x10] sm:$0xff] }
  0x14   : > { %1161 = vmatprep.subr.bf16.mxu0 %v1363_v16  ;;  %742 = vmatprep.mubr.bf16.mxu0 %v1096_v33  ;;  %v1393_v49 = vld [vmem:[%s1716_s2 + $0x168] sm:$0xff]   ;;  %v1100_v50 = vcombine.high %v297_v48, %v297_v48  ;;  %v1395_v52 = vld [vmem:[%s1716_s2 + $0x170] sm:$0xff]   ;;  %v1397_v54 = vld [vmem:[%s1716_s2 + $0x178] sm:$0xff]   ;;  %v1099_v56 = vcombine.low %v297_v48, %v297_v48 }
  0x15   : > { %1182 = vmatpush3.bf16.msra.mxu1 %v1362_v15  ;;  %782 = vmatprep.mubr.bf16.mxu1 %v1098_v38  ;;  %v1394_v51 = vld [vmem:[%s1716_s2 + $0x128] sm:$0xff]   ;;  %v1396_v53 = vld [vmem:[%s1716_s2 + $0x130] sm:$0xff]   ;;  %v1398_v55 = vld [vmem:[%s1716_s2 + $0x138] sm:$0xff]  }
  0x16   : > { %1183 = vmatprep.subr.bf16.mxu1 %v1365_v18  ;;  %v831_v57 = vld [vmem:[%s1718_s4] sm:$0xff]  ;;  %v832_v58 = vld [vmem:[%s1718_s4 + $0x8] sm:$0xff]  ;;  %v833_v59 = vld [vmem:[%s1718_s4 + $0x10] sm:$0xff]  ;;  %v1415_v18 = vmov 0.0  }
  0x17   : > { %1162 = vmatpush3.bf16.msra.mxu0 %v1364_v17  ;;  %v1300_v61 = vpack.c.bf16 %v832_v58, %v831_v57  ;;  %v834_v62 = vld [vmem:[%s1718_s4 + $0x18] sm:$0xff]  ;;  %v835_v0 = vld [vmem:[%s1718_s4 + $0x20] sm:$0xff]  ;;  %v836_v1 = vld [vmem:[%s1718_s4 + $0x28] sm:$0xff] }
  0x18   : > { %1163 = vmatprep.subr.bf16.mxu0 %v1367_v20  ;;  %v1303_v63 = vpack.c.bf16 %v834_v62, %v833_v59  ;;  %v1306_v2 = vpack.c.bf16 %v836_v1, %v835_v0  ;;  %v837_v3 = vld [vmem:[%s1718_s4 + $0x30] sm:$0xff]  ;;  %v838_v4 = vld [vmem:[%s1718_s4 + $0x38] sm:$0xff]  ;;  %v839_v6 = vld [vmem:[%s1718_s4 + $0x40] sm:$0xff] }
  0x19   : > { %1184 = vmatpush3.bf16.msra.mxu1 %v1366_v19  ;;  %v1309_v5 = vpack.c.bf16 %v838_v4, %v837_v3  ;;  %v840_v7 = vld [vmem:[%s1718_s4 + $0x48] sm:$0xff]  ;;  %v841_v9 = vld [vmem:[%s1718_s4 + $0x50] sm:$0xff]  ;;  %v842_v10 = vld [vmem:[%s1718_s4 + $0x58] sm:$0xff] }
  0x1a   : > { %1185 = vmatprep.subr.bf16.mxu1 %v1369_v22  ;;  %v1312_v8 = vpack.c.bf16 %v840_v7, %v839_v6  ;;  %v1315_v11 = vpack.c.bf16 %v842_v10, %v841_v9  ;;  %v843_v12 = vld [vmem:[%s1718_s4 + $0x60] sm:$0xff]  ;;  %v844_v13 = vld [vmem:[%s1718_s4 + $0x68] sm:$0xff]  ;;  %v845_v15 = vld [vmem:[%s1718_s4 + $0x70] sm:$0xff] }
  0x1b   : > { %1164 = vmatpush3.bf16.msra.mxu0 %v1368_v21  ;;  %v1318_v14 = vpack.c.bf16 %v844_v13, %v843_v12  ;;  %v846_v16 = vld [vmem:[%s1718_s4 + $0x78] sm:$0xff]  ;;  %v925_v19 = vld [vmem:[%s1720_s6] sm:$0xff]  ;;  %v926_v20 = vld [vmem:[%s1720_s6 + $0x8] sm:$0xff] }
  0x1c   : > { %1165 = vmatprep.subr.bf16.mxu0 %v1371_v24  ;;  %v1321_v17 = vpack.c.bf16 %v846_v16, %v845_v15  ;;  %v927_v21 = vld [vmem:[%s1720_s6 + $0x10] sm:$0xff]  ;;  %v1324_v22 = vpack.c.bf16 %v926_v20, %v925_v19 }
  0x1d   : > { %1186 = vmatpush3.bf16.msra.mxu1 %v1370_v23  ;;  %v928_v23 = vld [vmem:[%s1720_s6 + $0x18] sm:$0xff]  ;;  %v931_v48 = vld [vmem:[%s1720_s6 + $0x30] sm:$0xff] }
  0x1e   : > { %1187 = vmatprep.subr.bf16.mxu1 %v1373_v26  ;;  %v1327_v24 = vpack.c.bf16 %v928_v23, %v927_v21  ;;  %v930_v26 = vld [vmem:[%s1720_s6 + $0x28] sm:$0xff] }
  0x1f   : > { %1166 = vmatpush3.bf16.msra.mxu0 %v1372_v25  ;;  %v929_v25 = vld [vmem:[%s1720_s6 + $0x20] sm:$0xff] }
  0x20   : > { %1167 = vmatprep.subr.bf16.mxu0 %v1375_v28 }
  0x21   : > { %1188 = vmatpush3.bf16.msra.mxu1 %v1374_v27  ;;  %v1330_v27 = vpack.c.bf16 %v930_v26, %v929_v25 }
  0x22   : > { %1189 = vmatprep.subr.bf16.mxu1 %v1377_v30 }
  0x23   : > { %1168 = vmatpush3.bf16.msra.mxu0 %v1376_v29  ;;  %v1094_v29 = vld [vmem:[%s1717_s3] ss:$0 sm:$0xff] }
  0x24   : > { %1197 = vmatprep.subr.bf16.mxu0 %v1381_v35 }
  0x25   : > { %1190 = vmatpush3.bf16.msra.mxu1 %v1380_v34 }
  0x26   : > { %743 = vmatmul.mubr.bf16.vlgmr.msra.gmra.mrb[0].mxu0 %v1095_v32  ;;  %1299 = vmatprep.subr.bf16.mxu1 %v1413_v60 }
  0x27   : > { %1198 = vmatpush3.bf16.msra.mxu0 %v1384_v39  ;;  %822 = vmatprep.mubr.bf16.mxu0 %v1100_v50 }
  0x28   : > { %783 = vmatmul.mubr.bf16.vlgmr.msra.gmra.mrb[0].mxu1 %v1097_v37  ;;  %1199 = vmatprep.subr.bf16.mxu0 %v1385_v40 }
  0x29   : > { %1301 = vmatpush3.bf16.msra.mxu1 %v1300_v61  ;;  %1277 = vmatprep.mubr.msk.f32.mxu1 %vm1414_vm0, %v1415_v18 }
  0x2a   : > { %1302 = vmatprep.subr.bf16.mxu1 %v1413_v60 }
  0x2b   : > { %1200 = vmatpush3.bf16.msra.mxu0 %v1386_v41 }
  0x2c   : > { %1201 = vmatprep.subr.bf16.mxu0 %v1387_v42 }
  0x2d   : > { %1304 = vmatpush3.bf16.msra.mxu1 %v1303_v63 }
  0x2e   : > { %1305 = vmatprep.subr.bf16.mxu1 %v1413_v60 }
  0x2f   : > { %1202 = vmatpush3.bf16.msra.mxu0 %v1388_v43 }
  0x30   : > { %1203 = vmatprep.subr.bf16.mxu0 %v1389_v44 }
  0x31   : > { %1307 = vmatpush3.bf16.msra.mxu1 %v1306_v2 }
  0x32   : > { %1308 = vmatprep.subr.bf16.mxu1 %v1413_v60 }
  0x33   : > { %1204 = vmatpush3.bf16.msra.mxu0 %v1390_v45 }
  0x34   : > { %1205 = vmatprep.subr.bf16.mxu0 %v1391_v46 }
  0x35   : > { %1310 = vmatpush3.bf16.msra.mxu1 %v1309_v5 }
  0x36   : > { %1311 = vmatprep.subr.bf16.mxu1 %v1413_v60 }
  0x37   : > { %1206 = vmatpush3.bf16.msra.mxu0 %v1392_v47 }
  0x38   : > { %1207 = vmatprep.subr.bf16.mxu0 %v1393_v49  ;;  %v932_v49 = vld [vmem:[%s1720_s6 + $0x38] sm:$0xff] }
  0x39   : > { %1313 = vmatpush3.bf16.msra.mxu1 %v1312_v8  ;;  %v1333_v50 = vpack.c.bf16 %v932_v49, %v931_v48 }
  0x3a   : > { %1314 = vmatprep.subr.bf16.mxu1 %v1413_v60 }
  0x3b   : > { %1208 = vmatpush3.bf16.msra.mxu0 %v1394_v51  ;;  %v1149_v51 = vld [vmem:[%s1719_s5] ss:$0 sm:$0xff] }
  0x3c   : > { %1209 = vmatprep.subr.bf16.mxu0 %v1395_v52 }
  0x3d   : > { %1316 = vmatpush3.bf16.msra.mxu1 %v1315_v11 }
  0x3e   : > { %1317 = vmatprep.subr.bf16.mxu1 %v1413_v60 }
  0x3f   : > { %1210 = vmatpush3.bf16.msra.mxu0 %v1396_v53 }
  0x40   : > { %1211 = vmatprep.subr.bf16.mxu0 %v1397_v54 }
  0x41   : > { %1319 = vmatpush3.bf16.msra.mxu1 %v1318_v14 }
  0x42   : > { %1320 = vmatprep.subr.bf16.mxu1 %v1413_v60 }
  0x43   : > { %1212 = vmatpush3.bf16.msra.mxu0 %v1398_v55 }
  0x44   : > { %1323 = vmatprep.subr.bf16.mxu0 %v1413_v60 }
  0x45   : > { %1322 = vmatpush3.bf16.msra.mxu1 %v1321_v17 }
  0x46   : > { %823 = vmatmul.mubr.bf16.vlgmr.msra.gmra.mrb[4].mxu0 %v1099_v56  ;;  %v933_v56 = vld [vmem:[%s289_s12] sm:$0xff] }
  0x47   : > { %1296 = vmatprep.mubr.msk.f32.mxu0 %vm1414_vm0, %v1415_v18  ;;  %1325 = vmatpush3.bf16.msra.mxu0 %v1324_v22 }
  0x48   : > { %1326 = vmatprep.subr.bf16.mxu0 %v1413_v60 }
  0x4b   : > { %1328 = vmatpush3.bf16.msra.mxu0 %v1327_v24 }
  0x4c   : > { %1329 = vmatprep.subr.bf16.mxu0 %v1413_v60 }
  0x4f   : > { %1331 = vmatpush3.bf16.msra.mxu0 %v1330_v27 }
  0x50   : > { %1332 = vmatprep.subr.bf16.mxu0 %v1413_v60 }
  0x53   : > { %1334 = vmatpush3.bf16.msra.mxu0 %v1333_v50 }
  0xf9   : > { %v1169_v28 = vpop.f32.mrb[0].mxu0 }
  0xfa   : > { %v1170_v30 = vpop.f32.mrb[1].mxu0 }
  0xfb   : > { %v1171_v31 = vadd.f32 %v1170_v30, %v1169_v28  ;;  %v1172_v32 = vpop.f32.mrb[2].mxu0  ;;  %v1191_v33 = vpop.f32.mrb[0].mxu1 }
  0xfc   : > { %v1173_v34 = vpop.f32.mrb[3].mxu0  ;;  %v1192_v35 = vpop.f32.mrb[1].mxu1 }
  0xfd   : > { %v745_v36 = vadd.f32 %v1171_v31, %v1094_v29  ;;  %v1193_v37 = vadd.f32 %v1192_v35, %v1191_v33  ;;  %v1194_v38 = vpop.f32.mrb[2].mxu1 }
  0xfe   : > { %v1195_v39 = vpop.f32.mrb[3].mxu1 }
  0xff   : > { %v785_v40 = vadd.f32 %v1193_v37, %v745_v36 }
 0x119   : > { %v1213_v41 = vpop.f32.mrb[4].mxu0 }
 0x11a   : > { %v1214_v42 = vpop.f32.mrb[5].mxu0 }
 0x11b   : > { %v1215_v43 = vadd.f32 %v1214_v42, %v1213_v41  ;;  %v1216_v44 = vpop.f32.mrb[6].mxu0 }
 0x11c   : > { %v1217_v45 = vpop.f32.mrb[7].mxu0 }
 0x11d   : > { %v825_v46 = vadd.f32 %v1215_v43, %v785_v40 }
 0x11f   : > { %v830_v47 = vmax.f32 %v825_v46, 0.0 }
 0x121   : > { %1278 = vmatmul.mubr.f32.vlgmr.msra.gmra.mrb[4].mxu1 %v830_v47 }
 0x1f4   : > { %v920_v52 = vpop.f32.mrb[4].mxu1 }
 0x1f5   : > { %v921_v53 = vadd.f32 %v1149_v51, %v920_v52  ;;  %v1279_v54 = vpop.f32.mrb[5].mxu1 }
 0x1f7   : > { %v924_v55 = vmax.f32 %v921_v53, 0.0 }
 0x1f9   : > { %1297 = vmatmul.mubr.msk.f32.vlgmr.msra.gmra.mrb[8].mxu0 %vm934_vm1, %v924_v55 }
 0x2cc   : > { %v1004_v57 = vpop.f32.mrb[8].mxu0 }
 0x2cd   : > { %v1005_v58 = vadd.f32 %v1004_v57, %v933_v56  ;;  %v1298_v59 = vpop.f32.mrb[9].mxu0 }
 0x2cf   : > { %v1009_v60 = vsel %vm1008_vm2, %v1005_v58, -inf }
 0x2d0   : > { %1010 = vmax.xlane.f32.xlu0 %v1009_v60 }
 0x35d   : > { %v1011_v61 = vpop.xlane.xlu0 %1010 }
 0x35e   : > { %v1012_v62 = vsub.f32 %v1005_v58, %v1011_v61 }
 0x360   : > { %v1013_v63 = vmul.f32 1.442695, %v1012_v62 }
 0x362   : > { %1401 = vpow2.f32 %v1013_v63 }
 0x36c   : > { %v1402_v0 = vpop.eup %1401 }
 0x36d   : > { %v1015_v1 = vsel %vm1008_vm2, %v1402_v0, 0.0 }
 0x36e   : > { %1016 = vadd.xlane.f32.xlu0 %v1015_v1 }
 0x3fb   : > { %v1017_v2 = vpop.xlane.xlu0 %1016 }
 0x3fc   : > { %1403 = vrcp.f32 %v1017_v2 }
 0x406   : > { %v1404_v3 = vpop.eup %1403 }
 0x407   : > { %v1019_v4 = vmul.f32 %v1404_v3, %v1402_v0 }
 0x409   : > { %1020 = vst.msk [vmem:[%s293_s14] sm:$0xff] %vm1008_vm2, %v1019_v4 }
 0x40a PF: > { %s17_s24 = sadd.s32 1, %s1411_s24  }
 0x40b   : > { %p14_p4 = scmp.ge.s32.totalorder %s17_s24, 4  }
 0x40d   :  { %16 = sbr.rel (!%p14_p4) target bundleno = 1 (0x1), region = 81 }

</bundles_post_ra>
